<compile_context>
chip_gen: v6e
topology: v6e:2x2x1
jax: 0.10.0
libtpu: 0.0.40
codegen_flags: <defaults>
</compile_context>

<pallas_src>
import math

import numpy as np
import jax
import jax.numpy as jnp
from jax.experimental import pallas as pl
from jax.experimental.pallas import tpu as pltpu

_INV_SQRT2 = 1.0 / math.sqrt(2.0)


# ---------------------------------------------------------------------------
# Haar DWT matrices (only used by the pure-JAX reference below)
# ---------------------------------------------------------------------------
def _haar_dwt_matrices(H, W):
    """Returns (Ml0 (H/2,H), Mh0 (H/2,H), Ml1 (W,W/2), Mh1 (W,W/2)) as numpy f32."""
    rec_lo = np.array([_INV_SQRT2, _INV_SQRT2], np.float32)
    rec_hi = np.array([_INV_SQRT2, -_INV_SQRT2], np.float32)

    def banded(rows, cols, band):
        m = np.zeros((rows, cols), np.float32)
        for i in range(rows):
            m[i, 2 * i: 2 * i + 2] = band
        return m

    ml0 = banded(H // 2, H, rec_lo)
    mh0 = banded(H // 2, H, rec_hi)
    ml1 = banded(W // 2, W, rec_lo).T
    mh1 = banded(W // 2, W, rec_hi).T
    return ml0, mh0, ml1, mh1
    # TODO(synk): non-'haar' wavelets would need pywt filter taps; only the module's
    # default wavename='haar' (for which the closed form below is exact) is built in.


# ---------------------------------------------------------------------------
# Closed-form selection matrices (the 0.5 scale is folded in; exact in bf16 too)
# ---------------------------------------------------------------------------
def _col_select_matrix(W):
    """B (W, W/2) with B[2j, j] = 0.5:  y = rows @ B  picks even columns * 0.5."""
    Wout = W // 2
    b = np.zeros((W, Wout), np.float32)
    b[2 * np.arange(Wout), np.arange(Wout)] = 0.5
    return b


def _flat_select_matrix(H, W):
    """Bbig (H*W, Hout*Wout) mapping a flattened plane to its 0.5 * x[::2, ::2]."""
    Hout, Wout = H // 2, W // 2
    b = np.zeros((H * W, Hout * Wout), np.float32)
    ii, jj = np.meshgrid(np.arange(Hout), np.arange(Wout), indexing="ij")
    b[(2 * ii * W + 2 * jj).ravel(), (ii * Wout + jj).ravel()] = 0.5
    return b


# ---------------------------------------------------------------------------
# Pallas kernels
# ---------------------------------------------------------------------------
def _flat_kernel(b_ref, x_ref, o_ref):
    """Small-plane path.

    b_ref: (H*W, Hout*Wout)   0.5-scaled flat selection matrix, resident
    x_ref: (tp, H*W)          tp flattened channel planes (lane-dense loads)
    o_ref: (tp, Hout*Wout)    flattened outputs (lane-dense stores)
    """
    o_ref[...] = jnp.dot(
        x_ref[...], b_ref[...], preferred_element_type=jnp.float32
    ).astype(o_ref.dtype)


def _planes_kernel(b_ref, x_ref, o_ref):
    """Large-plane path.

    b_ref: (W, Wout)          0.5-scaled column selector, resident
    x_ref: (tp, H, W)         tp channel planes
    o_ref: (tp, Hout, Wout)
    """
    tp = x_ref.shape[0]
    b = b_ref[...]                                 # hoisted out of the loop

    def body(p, carry):
        rows = x_ref[p][::2, :]                    # even rows: sublane stride-2 slice
        o_ref[p] = jnp.dot(
            rows, b, preferred_element_type=jnp.float32
        ).astype(o_ref.dtype)
        return carry

    jax.lax.fori_loop(0, tp, body, 0)
    # TODO(synk): when W % 128 == 0 the even rows could be DMA'd directly (reshape to
    # (P, Hout, 2W) + half-row blocks), halving HBM read traffic; and when Wout < 128
    # a lane-dense flattened out_spec would avoid masked stores.


# ---------------------------------------------------------------------------
# Wrapper
# ---------------------------------------------------------------------------
def _round_up(x, m):
    return (x + m - 1) // m * m


def _pick_tp(P, per_plane_bytes, need_mult8, budget_bytes):
    """Planes per block: VMEM-budgeted, prefers >=2 grid blocks and exact divisors.

    need_mult8: the flat path's (tp, H*W)/(tp, Hout*Wout) blocks put tp on the
    sublane axis, so tp must be a multiple of 8 or equal to the full extent P.
    """
    cap = int(max(1, min(P, budget_bytes // max(per_plane_bytes, 1))))
    if cap >= P and P > 1:
        cap = -(-P // 2)            # keep >= 2 blocks for megacore / pipelining
    for tp in range(cap, 0, -1):    # prefer exact divisors (every block full)
        if P % tp == 0 and (not need_mult8 or tp % 8 == 0 or tp == P):
            return tp
    return P                        # fallback: one block covering all planes


def downsample(x, *, block_budget_bytes=8 << 20):
    """x: (N, C, H, W) -> (N, C, H//2, W//2), matching Downsample.forward."""
    N, C, H, W = x.shape
    if H % 2 or W % 2:
        raise ValueError("haar Downsample requires even spatial dims")
    Hout, Wout = H // 2, W // 2
    P = N * C
    isz = jnp.dtype(x.dtype).itemsize

    xr = x.reshape(P, H, W)         # free reshape: flatten (N, C) -> plane axis

    # Small-plane (lane-dense) path whenever the flat selector stays small.
    use_flat = (H * W) * (Hout * Wout) * 4 <= (2 << 20)

    if use_flat:
        bsel = jnp.asarray(_flat_select_matrix(H, W), dtype=x.dtype)
        x2 = xr.reshape(P, H * W)   # free reshape (contiguous)

        per_plane = (_round_up(H * W, 128) + _round_up(Hout * Wout, 128)) * isz
        tp = _pick_tp(P, per_plane, need_mult8=True, budget_bytes=block_budget_bytes)
        grid = (pl.cdiv(P, tp),)

        in_b = _round_up(tp, 8) * _round_up(H * W, 128) * isz
        out_b = _round_up(tp, 8) * _round_up(Hout * Wout, 128) * isz
        sel_b = _round_up(H * W, 8) * _round_up(Hout * Wout, 128) * isz
        vmem_need = 2 * (in_b + out_b) + sel_b

        out2 = pl.pallas_call(
            _flat_kernel,
            out_shape=jax.ShapeDtypeStruct((P, Hout * Wout), x.dtype),
            grid=grid,
            in_specs=[
                pl.BlockSpec((H * W, Hout * Wout), lambda pb: (0, 0)),  # resident
                pl.BlockSpec((tp, H * W), lambda pb: (pb, 0)),
            ],
            out_specs=pl.BlockSpec((tp, Hout * Wout), lambda pb: (pb, 0)),
            compiler_params=pltpu.CompilerParams(
                dimension_semantics=("parallel",),
                vmem_limit_bytes=max(32 << 20, int(1.5 * vmem_need) + (2 << 20)),
            ),
        )(bsel, x2)
        return out2.reshape(N, C, Hout, Wout)       # free reshape back

    # Large-plane path.
    bsel = jnp.asarray(_col_select_matrix(W), dtype=x.dtype)
    per_plane = (_round_up(H, 8) * _round_up(W, 128)
                 + _round_up(Hout, 8) * _round_up(Wout, 128)) * isz
    tp = _pick_tp(P, per_plane, need_mult8=False, budget_bytes=block_budget_bytes)
    grid = (pl.cdiv(P, tp),)

    in_b = tp * _round_up(H, 8) * _round_up(W, 128) * isz
    out_b = tp * _round_up(Hout, 8) * _round_up(Wout, 128) * isz
    sel_b = _round_up(W, 8) * _round_up(Wout, 128) * isz
    vmem_need = 2 * (in_b + out_b) + sel_b

    out3 = pl.pallas_call(
        _planes_kernel,
        out_shape=jax.ShapeDtypeStruct((P, Hout, Wout), x.dtype),
        grid=grid,
        in_specs=[
            pl.BlockSpec((W, Wout), lambda pb: (0, 0)),                 # resident
            pl.BlockSpec((tp, H, W), lambda pb: (pb, 0, 0)),
        ],
        out_specs=pl.BlockSpec((tp, Hout, Wout), lambda pb: (pb, 0, 0)),
        compiler_params=pltpu.CompilerParams(
            dimension_semantics=("parallel",),
            vmem_limit_bytes=max(32 << 20, int(1.5 * vmem_need) + (2 << 20)),
        ),
    )(bsel, xr)
    return out3.reshape(N, C, Hout, Wout)


downsample_jit = jax.jit(downsample)


# ---------------------------------------------------------------------------
# Pure-JAX reference: literal DWTFunction_2D + (LL+LH+HL+HH)/4
# ---------------------------------------------------------------------------
def downsample_ref(x):
    N, C, H, W = x.shape
    ml0, mh0, ml1, mh1 = (jnp.asarray(m) for m in _haar_dwt_matrices(H, W))
    hp = jax.lax.Precision.HIGHEST
    L = jnp.einsum("rh,nchw->ncrw", ml0, x, precision=hp)
    Hh = jnp.einsum("rh,nchw->ncrw", mh0, x, precision=hp)
    LL = jnp.einsum("ncrw,wq->ncrq", L, ml1, precision=hp)
    LH = jnp.einsum("ncrw,wq->ncrq", L, mh1, precision=hp)
    HL = jnp.einsum("ncrw,wq->ncrq", Hh, ml1, precision=hp)
    HH = jnp.einsum("ncrw,wq->ncrq", Hh, mh1, precision=hp)
    return (LL + LH + HL + HH) / 4.0


if __name__ == "__main__":
    key = jax.random.PRNGKey(0)
    # Small deterministic input consistent with the module: (N, C, H, W).
    x = jax.random.normal(key, (2, 4, 16, 16), jnp.float32)

    out = jax.block_until_ready(downsample_jit(x))
    assert out.shape == (2, 4, 8, 8), out.shape
    assert out.dtype == jnp.float32

    ref = jax.block_until_ready(downsample_ref(x))
    if not jnp.allclose(out, ref, rtol=1e-3, atol=1e-3):
        err = float(jnp.max(jnp.abs(out - ref)))
        raise AssertionError(f"Pallas Downsample mismatch vs reference, max err {err}")

    print("KERNEL_OK")
</pallas_src>

<mosaic_0001>
module attributes {stable_mosaic.version = 11 : i64} {
  func.func @_flat_kernel(%arg0: i32, %arg1: memref<256x64xf32, #tpu.memory_space<vmem>>, %arg2: memref<8x256xf32, #tpu.memory_space<vmem>>, %arg3: memref<8x64xf32, #tpu.memory_space<vmem>>) attributes {dimension_semantics = [#tpu.dimension_semantics<parallel>], iteration_bounds = array<i64: 1>, scalar_prefetch = 0 : i64, scratch_operands = 0 : i64, tpu.core_type = #tpu.core_type<tc>, window_params = [{pipeline_mode = #tpu.pipeline_mode<synchronous>, transform_indices = @transform_0, window_bounds = array<i64: 256, 64>}, {transform_indices = @transform_1, window_bounds = array<i64: 8, 256>}, {transform_indices = @transform_2, window_bounds = array<i64: 8, 64>}]} {
    %c0 = arith.constant 0 : index
    %c0_0 = arith.constant 0 : index
    %0 = vector.load %arg2[%c0, %c0_0] : memref<8x256xf32, #tpu.memory_space<vmem>>, vector<8x256xf32>
    %c0_1 = arith.constant 0 : index
    %c0_2 = arith.constant 0 : index
    %1 = vector.load %arg1[%c0_1, %c0_2] : memref<256x64xf32, #tpu.memory_space<vmem>>, vector<256x64xf32>
    %cst = arith.constant dense<0.000000e+00> : vector<8x64xf32>
    %2 = tpu.matmul %0, %1, %cst {dimension_numbers = #tpu.dot_dimension_numbers<[1], [0], [0], [1], [0, 0, 1, 1], [], []>} : vector<8x256xf32>, vector<256x64xf32>, vector<8x64xf32> -> vector<8x64xf32>
    %c0_3 = arith.constant 0 : index
    %c0_4 = arith.constant 0 : index
    %3 = vector.load %arg3[%c0_3, %c0_4] : memref<8x64xf32, #tpu.memory_space<vmem>>, vector<8x64xf32>
    tpu.vector_store %arg3[%c0_3, %c0_4], %2 {strides = array<i32>} : memref<8x64xf32, #tpu.memory_space<vmem>>, vector<8x64xf32>,
    return
  }
  func.func @transform_0(%arg0: i32) -> (i32, i32) {
    %c0_i32 = arith.constant 0 : i32
    %c0_i32_0 = arith.constant 0 : i32
    %c0_i32_1 = arith.constant 0 : i32
    return %c0_i32, %c0_i32_0 : i32, i32
  }
  func.func @transform_1(%arg0: i32) -> (i32, i32) {
    %c0_i32 = arith.constant 0 : i32
    %c0_i32_0 = arith.constant 0 : i32
    return %arg0, %c0_i32 : i32, i32
  }
  func.func @transform_2(%arg0: i32) -> (i32, i32) {
    %c0_i32 = arith.constant 0 : i32
    %c0_i32_0 = arith.constant 0 : i32
    return %arg0, %c0_i32 : i32, i32
  }
}

</mosaic_0001>

<bundles_post_ra>
// kernel: downsample.1
= control target key start
LH: loop header
LB: loop body
LE: loop exit
PB: predicated region body
PF: predicated region fallthrough
CT: control target
= control target key end

     0   :  { %7 = vsyncpa [#allocation3], 0  ;;  %s196_s9 = smov [#allocation2]   ;;  %s226_s0 = inlined_call_operand.hbm [shape: f32[256,64], index: 0, kind: input, shape index: {}]   ;;  %s227_s1 = inlined_call_operand.vmem [shape: f32[8,256], index: 1, kind: input, shape index: {}]   ;;  %s228_s2 = inlined_call_operand.vmem [shape: f32[8,64], index: 2, kind: output, shape index: {}]  }
   0x1   :  { %s13_s10 = sshll.u32 %s196_s9, 4  ;;  %s14_s10 = int_to_ptr.vmem [resolvable:$true] %s13_s10 }
   0x2   :  { %s182_s11 = scalar_lea.vmem %s14_s10, 4096  ;;  %p187_p1 = scmp.lt.s32.totalorder %s14_s10, %s14_s10 }
   0x3   :  { %p183_p0 = scmp.ne.s32.totalorder %s14_s10, %s182_s11  ;;  %p188_p2 = scmp.lt.s32.totalorder %s182_s11, %s182_s11 }
   0x5   :  { %p189_p3 = por %p188_p2, %p187_p1 }
   0x7   :  { %p190_p4 = pnand %p189_p3, %p183_p0 }
   0x9   :  { %193 = shalt.err (!%p190_p4)
}
   0xa   :  { %s197_s12 = smov 128   ;;  %s198_s13 = smov 8  }
   0xb   :  { %19 = dma.hbm_to_vmem [thread:$0]  %s226_s0, 4096, %s14_s10, [#allocation3], %s197_s12, %s197_s12, %s198_s13  }
   0xc   :  { %194 = dma.done.wait [#allocation3], 4096  }
   0xd   :  { %195 = vsyncadd [#allocation3], 4294963200  ;;  %v58_v0 = vld [vmem:[#allocation2 + $0xf8] sm:$0xff]  ;;  %v57_v2 = vld [vmem:[#allocation2 + $0xf0] sm:$0xff]  ;;  %vm129_vm0 = vcmask 523264  }
   0xe   :  { %v42_v1 = vld [vmem:[#allocation2 + $0x78] sm:$0xff]  ;;  %136 = vmatprep.subr.mxu0 %v58_v0  ;;  %v41_v3 = vld [vmem:[#allocation2 + $0x70] sm:$0xff]  ;;  %v56_v4 = vld [vmem:[#allocation2 + $0xe8] sm:$0xff] }
   0xf   :  { %137 = vmatpush3.msra.mxu0 %v42_v1  ;;  %v40_v5 = vld [vmem:[#allocation2 + $0x68] sm:$0xff]  ;;  %v55_v6 = vld [vmem:[#allocation2 + $0xe0] sm:$0xff]  ;;  %v54_v8 = vld [vmem:[#allocation2 + $0xd8] sm:$0xff] }
  0x10   :  { %138 = vmatprep.subr.mxu0 %v57_v2  ;;  %v39_v7 = vld [vmem:[#allocation2 + $0x60] sm:$0xff]  ;;  %v38_v9 = vld [vmem:[#allocation2 + $0x58] sm:$0xff]  ;;  %v53_v10 = vld [vmem:[#allocation2 + $0xd0] sm:$0xff] }
  0x11   :  { %139 = vmatpush3.msra.mxu0 %v41_v3  ;;  %v37_v11 = vld [vmem:[#allocation2 + $0x50] sm:$0xff]  ;;  %v52_v12 = vld [vmem:[#allocation2 + $0xc8] sm:$0xff]  ;;  %v51_v15 = vld [vmem:[#allocation2 + $0xc0] sm:$0xff] }
  0x12   :  { %140 = vmatprep.subr.mxu0 %v56_v4  ;;  %v26_v13 = vld [vmem:[%s227_s1 + $0x8] sm:$0xff]  ;;  %v35_v16 = vld [vmem:[#allocation2 + $0x40] sm:$0xff]  ;;  %v50_v17 = vld [vmem:[#allocation2 + $0xb8] sm:$0xff] }
  0x13   :  { %141 = vmatpush3.msra.mxu0 %v40_v5  ;;  %v36_v14 = vld [vmem:[#allocation2 + $0x48] sm:$0xff]  ;;  %123 = vmatprep.mubr.f32.mxu0 %v26_v13  ;;  %v34_v18 = vld [vmem:[#allocation2 + $0x38] sm:$0xff]  ;;  %v49_v19 = vld [vmem:[#allocation2 + $0xb0] sm:$0xff] }
  0x14   :  { %142 = vmatprep.subr.mxu0 %v55_v6  ;;  %v33_v20 = vld [vmem:[#allocation2 + $0x30] sm:$0xff]  ;;  %v48_v21 = vld [vmem:[#allocation2 + $0xa8] sm:$0xff]  ;;  %v47_v23 = vld [vmem:[#allocation2 + $0xa0] sm:$0xff] }
  0x15   :  { %143 = vmatpush3.msra.mxu0 %v39_v7  ;;  %v32_v22 = vld [vmem:[#allocation2 + $0x28] sm:$0xff]  ;;  %v31_v24 = vld [vmem:[#allocation2 + $0x20] sm:$0xff]  ;;  %v46_v25 = vld [vmem:[#allocation2 + $0x98] sm:$0xff] }
  0x16   :  { %144 = vmatprep.subr.mxu0 %v54_v8  ;;  %v30_v26 = vld [vmem:[#allocation2 + $0x18] sm:$0xff]  ;;  %v45_v27 = vld [vmem:[#allocation2 + $0x90] sm:$0xff]  ;;  %v44_v29 = vld [vmem:[#allocation2 + $0x88] sm:$0xff] }
  0x17   :  { %145 = vmatpush3.msra.mxu0 %v38_v9  ;;  %v29_v28 = vld [vmem:[#allocation2 + $0x10] sm:$0xff]  ;;  %v28_v30 = vld [vmem:[#allocation2 + $0x8] sm:$0xff]  ;;  %v43_v31 = vld [vmem:[#allocation2 + $0x80] sm:$0xff] }
  0x18   :  { %146 = vmatprep.subr.mxu0 %v53_v10  ;;  %v27_v32 = vld [vmem:[#allocation2] sm:$0xff] }
  0x19   :  { %147 = vmatpush3.msra.mxu0 %v37_v11  ;;  %v25_v33 = vld [vmem:[%s227_s1] sm:$0xff] }
  0x1a   :  { %148 = vmatprep.subr.mxu0 %v52_v12 }
  0x1b   :  { %149 = vmatpush3.msra.mxu0 %v36_v14 }
  0x1c   :  { %150 = vmatprep.subr.mxu0 %v51_v15 }
  0x1d   :  { %151 = vmatpush3.msra.mxu0 %v35_v16 }
  0x1e   :  { %152 = vmatprep.subr.mxu0 %v50_v17 }
  0x1f   :  { %153 = vmatpush3.msra.mxu0 %v34_v18 }
  0x20   :  { %154 = vmatprep.subr.mxu0 %v49_v19 }
  0x21   :  { %155 = vmatpush3.msra.mxu0 %v33_v20 }
  0x22   :  { %156 = vmatprep.subr.mxu0 %v48_v21 }
  0x23   :  { %157 = vmatpush3.msra.mxu0 %v32_v22 }
  0x24   :  { %158 = vmatprep.subr.mxu0 %v47_v23 }
  0x25   :  { %159 = vmatpush3.msra.mxu0 %v31_v24 }
  0x26   :  { %160 = vmatprep.subr.mxu0 %v46_v25 }
  0x27   :  { %161 = vmatpush3.msra.mxu0 %v30_v26 }
  0x28   :  { %162 = vmatprep.subr.mxu0 %v45_v27 }
  0x29   :  { %163 = vmatpush3.msra.mxu0 %v29_v28 }
  0x2a   :  { %164 = vmatprep.subr.mxu0 %v44_v29 }
  0x2b   :  { %165 = vmatpush3.msra.mxu0 %v28_v30 }
  0x2c   :  { %166 = vmatprep.subr.mxu0 %v43_v31 }
  0x2d   :  { %167 = vmatpush3.msra.mxu0 %v27_v32 }
  0x2e   :  { %124 = vmatmul.mubr.f32.vlgmr.msra.gmra.mxu0 %v25_v33 }
  0xee   :  { %v168_v34 = vpop.f32.mrf.mxu0 }
  0xf0   :  { %v169_v35 = vpop.f32.mrf.mxu0 }
  0xf1   :  { %v170_v36 = vadd.f32 %v169_v35, %v168_v34 }
  0xf3   :  { %130 = vst.msk [vmem:[%s228_s2] sm:$0xff] %vm129_vm0, %v170_v36 }
  0xf4   :  { %135 = vsyncpa [#allocation3], 1 }

</bundles_post_ra>
